<compile_context>
chip_gen: v6e
topology: v6e:2x2x1
jax: 0.10.0
libtpu: 0.0.40
codegen_flags: <defaults>
</compile_context>

<pallas_src>
import functools

import numpy as np

import jax
import jax.numpy as jnp
from jax import lax
from jax.experimental import pallas as pl
from jax.experimental.pallas import tpu as pltpu


def _tpu_budget():
    """Best-effort (VMEM capacity, TensorCore count); safe defaults otherwise."""
    cap, cores = 64 * 1024 * 1024, 1
    get_info = getattr(pltpu, "get_tpu_info", None)
    if get_info is not None:
        try:
            info = get_info()
            cap = int(getattr(info, "vmem_capacity_bytes", cap) or cap)
            for name in ("num_cores", "core_count", "tensorcore_count"):
                v = getattr(info, name, None)
                if v:
                    cores = int(v)
                    break
        except Exception:   # pure query; keep conservative defaults off-TPU
            pass
    return cap, cores


@functools.lru_cache(maxsize=16)
def _dft_matrices(N, dtype_name):
    """Fused real DFT / inverse-DFT (norm='ortho') matrices, cached per (N, dtype)."""
    F = N // 2 + 1
    Fp = ((F + 7) // 8) * 8
    n = np.arange(N, dtype=np.float64)
    k = np.arange(F, dtype=np.float64)
    ang = 2.0 * np.pi * np.outer(k, n) / float(N)                     # (F, N)
    inv = 1.0 / np.sqrt(float(N))
    cos_kn = np.cos(ang) * inv
    sin_kn = np.sin(ang) * inv
    pad = ((0, Fp - F), (0, 0))
    cf = np.concatenate([np.pad(cos_kn, pad), np.pad(-sin_kn, pad)], 0)  # (2Fp, N)
    scale = np.full((F, 1), 2.0)
    scale[0, 0] = 1.0
    if N % 2 == 0:
        scale[N // 2, 0] = 1.0
    cc = np.pad((cos_kn * scale).T, ((0, 0), (0, Fp - F)))            # (N, Fp)
    cs = np.pad((-sin_kn * scale).T, ((0, 0), (0, Fp - F)))           # (N, Fp)
    dt = jnp.dtype(dtype_name)
    return jnp.asarray(cf, dt), jnp.asarray(cc, dt), jnp.asarray(cs, dt)


def _pick_batch_tile(B, C, min_tiles, max_lane_width=1024):
    """Batches per lane tile so Bt*C packs lanes densely (256-multiple preferred)."""
    best_bt, best_key = 1, None
    for bt in range(1, B + 1):
        wt = max(128, ((bt * C + 127) // 128) * 128)
        if wt > max_lane_width and bt > 1:
            break
        nt = (B + bt - 1) // bt
        if nt < min_tiles and bt > 1:
            continue
        dead = (wt - bt * C) * nt + (nt * bt - B) * C
        key = (0 if wt % 256 == 0 else 1, dead, -wt)
        if best_key is None or key < best_key:
            best_bt, best_key = bt, key
    return best_bt


def _pick_seq_tile(N, Fp, Wt, Bt, x_bytes, mm_bytes, out_bytes, budget):
    """Largest sequence tile whose resident footprint fits the VMEM budget."""
    def footprint(nt_):
        return (2 * nt_ * Wt * x_bytes                 # x (double buffered)
                + 4 * Fp * nt_ * mm_bytes              # cf
                + 4 * nt_ * Fp * mm_bytes              # cc + cs
                + 2 * nt_ * Wt * out_bytes             # out
                + 2 * (Bt + 4) * Wt * 4                # gt + w4
                + 48 * Fp * Wt + 16 * Fp * Fp)         # scratch + temporaries
    if footprint(N) <= budget or N % 128 != 0:
        # TODO(synk): very large N that is not a 128-multiple keeps the DFT
        # matrices fully resident; pad N host-side if that case ever matters.
        return N
    for cand in (1024, 512, 256, 128):
        if N % cand == 0 and cand < N and footprint(cand) <= budget:
            return cand
    return 128 if N % 128 == 0 else N


def _adaptive_spectral_kernel(x_ref, cf_ref, cc_ref, cs_ref, gt_ref, w_ref, thr_ref,
                              o_ref, spec_ref, yr_ref, yi_ref, *,
                              n_freq, n_rfft_steps, approx_recip):
    """One step of the (lane-tile, rfft/irfft-phase) grid.

    Phase p: p < NP accumulates one (2Fp,Nt)@(Nt,Wt) rfft chunk into spec_ref;
    at p == NP-1 the per-batch lower-median / adaptive mask is computed and
    folded into effective complex weights producing yr/yi; every p >= NP-1
    emits one (Nt,Wt) irfft output tile via cc@yr + cs@yi.
    """
    F = n_freq
    NP = n_rfft_steps
    Fp = yr_ref.shape[0]
    Bt = gt_ref.shape[0]
    p = pl.program_id(1)

    @pl.when(p == 0)
    def _init():
        spec_ref[...] = jnp.zeros_like(spec_ref)

    @pl.when(p < NP)
    def _rfft_step():
        x = x_ref[...].astype(cf_ref.dtype)
        spec_ref[...] += jnp.dot(cf_ref[...], x, preferred_element_type=jnp.float32)

    @pl.when(p == NP - 1)
    def _mask_and_weight():
        xr = spec_ref[:Fp, :]                                        # (Fp, Wt) f32
        xi = spec_ref[Fp:, :]
        gt = gt_ref[...]                                             # (Bt, Wt)

        # per-(frequency, batch) energy via one block-ones group matmul
        e2 = xr * xr + xi * xi                                       # (Fp, Wt)
        nt_dims = (((1,), (1,)), ((), ()))
        e_fb = lax.dot_general(e2, gt, nt_dims,
                               preferred_element_type=jnp.float32)   # (Fp, Bt)

        row_i = lax.broadcasted_iota(jnp.int32, (Fp, Fp), 0)
        col_j = lax.broadcasted_iota(jnp.int32, (Fp, Fp), 1)
        count_mask = jnp.logical_and(row_i != col_j, row_i < F)      # comparands
        valid_j = lax.broadcasted_iota(jnp.int32, (1, Fp), 1) < F    # candidates
        m_rank = jnp.float32((F - 1) // 2)                           # torch lower median
        thr = thr_ref[0, 0]

        def body(b, mask_fb):
            sel = (lax.broadcasted_iota(jnp.int32, (1, Bt), 1) == b
                   ).astype(jnp.float32)                             # (1, Bt)
            # Both views are exact picks from the SAME reduction (e_fb), so the
            # <, == comparisons below are tie-consistent.
            ec = jnp.sum(e_fb * sel, axis=1, keepdims=True)          # (Fp, 1)
            er = lax.dot_general(sel, e_fb, nt_dims,
                                 preferred_element_type=jnp.float32)  # (1, Fp)
            lt = jnp.logical_and(ec < er, count_mask).astype(jnp.float32)
            eq = jnp.logical_and(ec == er, count_mask).astype(jnp.float32)
            less_cnt = jnp.sum(lt, axis=0, keepdims=True)            # (1, Fp)
            leq_cnt = less_cnt + jnp.sum(eq, axis=0, keepdims=True) + 1.0  # +1: diag tie
            is_med = jnp.logical_and(
                jnp.logical_and(less_cnt <= m_rank, leq_cnt > m_rank),
                valid_j).astype(jnp.float32)                         # (1, Fp)
            med = (jnp.sum(er * is_med, axis=1, keepdims=True)
                   / jnp.maximum(jnp.sum(is_med, axis=1, keepdims=True), 1.0))
            denom = med + 1e-6
            if approx_recip:
                norm = ec * pl.reciprocal(denom, approx=True)        # EUP slot
            else:
                norm = ec / denom                                    # exact, matches ref
            mask_col = (norm > thr).astype(jnp.float32)              # (Fp, 1)
            return mask_fb + mask_col * sel                          # (Fp, Bt)

        mask_fb = lax.fori_loop(0, Bt, body, jnp.zeros((Fp, Bt), jnp.float32),
                                unroll=True)
        # scatter the per-batch mask to lanes with a single MXU matmul
        mask = jnp.dot(mask_fb, gt, preferred_element_type=jnp.float32)  # (Fp, Wt)

        wr, wi = w_ref[0:1, :], w_ref[1:2, :]
        whr, whi = w_ref[2:3, :], w_ref[3:4, :]
        wr_eff = wr + mask * whr
        wi_eff = wi + mask * whi
        yr_ref[...] = xr * wr_eff - xi * wi_eff
        yi_ref[...] = xr * wi_eff + xi * wr_eff

    @pl.when(p >= NP - 1)
    def _irfft_step():
        yr = yr_ref[...].astype(cc_ref.dtype)
        yi = yi_ref[...].astype(cc_ref.dtype)
        out = (jnp.dot(cc_ref[...], yr, preferred_element_type=jnp.float32)
               + jnp.dot(cs_ref[...], yi, preferred_element_type=jnp.float32))
        o_ref[...] = out.astype(o_ref.dtype)


def adaptive_spectral_block(x, complex_weight, complex_weight_high, threshold_param,
                            *, matmul_dtype=jnp.bfloat16, approx_reciprocal=False,
                            seq_tile=None, min_lane_tiles=None):
    """Forward of Adaptive_Spectral_Block (adaptive_filter=True).

    x: (B, N, C); complex_weight[_high]: (C, 2); threshold_param: (1,).
    matmul_dtype: MXU operand dtype (DFT matrices + packed x). bfloat16 is the
      fast path on v5e/v6e/v7x; pass float32 when the accuracy budget requires
      it.  Accumulators and the energy/median/mask math stay float32 either way.
    approx_reciprocal: use the EUP approximate reciprocal in the median
      normalisation (cheaper; ~1e-3 relative error on the threshold compare).
    seq_tile: optional override for the sequence-axis tile (divides N, 128-mult).
    min_lane_tiles: minimum lane-tile count (defaults to the detected
      TensorCore count so megacore parts get >= 2 parallel grid steps).
    """
    B, N, C = x.shape
    F = N // 2 + 1
    Fp = ((F + 7) // 8) * 8
    mm_dt = jnp.dtype(matmul_dtype)
    out_dt = x.dtype

    vmem_cap, cores = _tpu_budget()
    if min_lane_tiles is None:
        min_lane_tiles = max(1, min(cores, B))

    # ---- lane-dense packing: Bt whole batches per 128*k-wide lane tile ----
    Bt = _pick_batch_tile(B, C, min_lane_tiles)
    nt = (B + Bt - 1) // Bt
    Bpad = nt * Bt
    Wt = max(128, ((Bt * C + 127) // 128) * 128)

    xt = jnp.transpose(x, (1, 0, 2))                                 # (N, B, C)
    if Bpad > B:
        xt = jnp.pad(xt, ((0, 0), (0, Bpad - B), (0, 0)))
    xt = xt.reshape(N, nt, Bt * C)
    if Wt > Bt * C:
        xt = jnp.pad(xt, ((0, 0), (0, 0), (0, Wt - Bt * C)))
    xt = xt.reshape(N, nt * Wt)
    if mm_dt.itemsize < jnp.dtype(xt.dtype).itemsize:
        xt = xt.astype(mm_dt)                                        # halve the input DMA
    # TODO(synk): when C % 128 == 0 the repack could move in-kernel via a 3-D
    # BlockSpec (Bt, Nt, C) to drop this extra HBM round trip on x.

    cf, cc, cs = _dft_matrices(N, mm_dt.name)

    # ---- sequence tiling (rfft reduction steps / irfft output tiles) ----
    budget = max(24 * 1024 * 1024, int(0.55 * vmem_cap))
    if seq_tile is None:
        Nt = _pick_seq_tile(N, Fp, Wt, Bt, jnp.dtype(xt.dtype).itemsize,
                            mm_dt.itemsize, jnp.dtype(out_dt).itemsize, budget)
    else:
        Nt = int(seq_tile)
        assert N % Nt == 0 and (Nt == N or Nt % 128 == 0)
    NP = N // Nt

    # ---- batch-membership matrix and per-lane complex weights ----
    col = jnp.arange(Wt)
    gt = jnp.logical_and((col[None, :] // C) == jnp.arange(Bt)[:, None],
                         (col < Bt * C)[None, :]).astype(jnp.float32)  # (Bt, Wt)

    def _tile_row(v):
        return jnp.pad(jnp.tile(v.astype(jnp.float32), Bt), (0, Wt - Bt * C))

    w4 = jnp.stack([_tile_row(complex_weight[:, 0]),
                    _tile_row(complex_weight[:, 1]),
                    _tile_row(complex_weight_high[:, 0]),
                    _tile_row(complex_weight_high[:, 1])], axis=0)      # (4, Wt)
    thr = jnp.reshape(threshold_param.astype(jnp.float32), (1, 1))

    kernel = functools.partial(_adaptive_spectral_kernel, n_freq=F,
                               n_rfft_steps=NP,
                               approx_recip=bool(approx_reciprocal))

    # ---- cost & VMEM hints ----
    mm_flops = nt * Wt * (4 * Fp * N + 4 * Fp * N + 2 * Fp * Bt + 2 * Fp * Bt)
    vpu_flops = nt * (14 * Fp * Wt + Bt * (6 * Fp * Fp + 8 * Fp))
    bytes_accessed = (xt.size * xt.dtype.itemsize
                      + N * nt * Wt * jnp.dtype(out_dt).itemsize
                      + (cf.size + cc.size + cs.size) * mm_dt.itemsize
                      + (gt.size + w4.size) * 4)
    cost = pl.CostEstimate(flops=int(mm_flops + vpu_flops),
                           transcendentals=int(nt * Bt if approx_reciprocal else 0),
                           bytes_accessed=int(bytes_accessed))

    resident = (2 * Nt * Wt * xt.dtype.itemsize
                + 4 * Fp * Nt * mm_dt.itemsize
                + 4 * Nt * Fp * mm_dt.itemsize
                + 2 * Nt * Wt * jnp.dtype(out_dt).itemsize
                + 2 * (Bt + 4) * Wt * 4
                + 48 * Fp * Wt + 16 * Fp * Fp)
    vmem_limit = int(min(int(0.75 * vmem_cap),
                         max(32 * 1024 * 1024, 2 * resident)))

    NPm1 = NP - 1
    out_flat = pl.pallas_call(
        kernel,
        out_shape=jax.ShapeDtypeStruct((N, nt * Wt), out_dt),
        grid_spec=pltpu.PrefetchScalarGridSpec(
            num_scalar_prefetch=0,
            grid=(nt, 2 * NP - 1),
            in_specs=[
                pl.BlockSpec((Nt, Wt), lambda t, p: (jnp.minimum(p, NPm1), t)),
                pl.BlockSpec((2 * Fp, Nt), lambda t, p: (0, jnp.minimum(p, NPm1))),
                pl.BlockSpec((Nt, Fp), lambda t, p: (jnp.maximum(p - NPm1, 0), 0)),
                pl.BlockSpec((Nt, Fp), lambda t, p: (jnp.maximum(p - NPm1, 0), 0)),
                pl.BlockSpec((Bt, Wt), lambda t, p: (0, 0)),
                pl.BlockSpec((4, Wt), lambda t, p: (0, 0)),
                pl.BlockSpec(memory_space=pltpu.MemorySpace.SMEM),
            ],
            out_specs=pl.BlockSpec((Nt, Wt),
                                   lambda t, p: (jnp.maximum(p - NPm1, 0), t)),
            scratch_shapes=[pltpu.VMEM((2 * Fp, Wt), jnp.float32),
                            pltpu.VMEM((Fp, Wt), jnp.float32),
                            pltpu.VMEM((Fp, Wt), jnp.float32)],
        ),
        compiler_params=pltpu.CompilerParams(
            dimension_semantics=("parallel", "arbitrary"),
            vmem_limit_bytes=vmem_limit),
        cost_estimate=cost,
    )(xt, cf, cc, cs, gt, w4, thr)

    out = out_flat.reshape(N, nt, Wt)[:, :, :Bt * C]
    out = out.reshape(N, Bpad, C)[:, :B, :]
    return jnp.transpose(out, (1, 0, 2))


def _reference(x, cw, cwh, thr):
    """Pure-JAX reference matching the PyTorch forward (adaptive_filter=True)."""
    B, N, C = x.shape
    x32 = x.astype(jnp.float32)
    x_fft = jnp.fft.rfft(x32, axis=1, norm="ortho")                  # (B, F, C)
    w = cw[:, 0] + 1j * cw[:, 1]
    x_weighted = x_fft * w
    energy = jnp.sum(jnp.abs(x_fft) ** 2, axis=-1)                   # (B, F)
    Fdim = energy.shape[1]
    med = jnp.sort(energy, axis=1)[:, (Fdim - 1) // 2][:, None]      # torch lower median
    normalized = energy / (med + 1e-6)
    mask = (normalized > thr[0]).astype(jnp.float32)[..., None]
    wh = cwh[:, 0] + 1j * cwh[:, 1]
    x_weighted = x_weighted + (x_fft * mask) * wh
    out = jnp.fft.irfft(x_weighted, n=N, axis=1, norm="ortho")
    return out.astype(x.dtype)


if __name__ == "__main__":
    key = jax.random.PRNGKey(0)
    k1, k2, k3 = jax.random.split(key, 3)

    # ---- config A: small shapes, strict f32 check against the FFT reference ----
    B, N, C = 2, 16, 32
    complex_weight = 0.02 * jax.random.truncated_normal(k1, -2.0, 2.0, (C, 2),
                                                        jnp.float32)
    complex_weight_high = 0.02 * jax.random.truncated_normal(k2, -2.0, 2.0, (C, 2),
                                                             jnp.float32)
    threshold_param = jnp.array([0.43], jnp.float32)   # deterministic stand-in for rand(1)
    x = jax.random.normal(k3, (B, N, C), jnp.float32)

    out = adaptive_spectral_block(x, complex_weight, complex_weight_high,
                                  threshold_param, matmul_dtype=jnp.float32)
    out = jax.block_until_ready(out)
    ref = _reference(x, complex_weight, complex_weight_high, threshold_param)
    assert out.shape == (B, N, C) and out.dtype == x.dtype
    assert bool(jnp.allclose(out, ref, atol=1e-3, rtol=1e-3)), \
        "Pallas kernel (f32 MXU) does not match JAX reference"

    # ---- config A on the fast path: bf16 MXU operands + approx reciprocal ----
    out_bf = adaptive_spectral_block(x, complex_weight, complex_weight_high,
                                     threshold_param, approx_reciprocal=True)
    out_bf = jax.block_until_ready(out_bf)
    assert out_bf.shape == (B, N, C) and bool(jnp.all(jnp.isfinite(out_bf)))
    assert float(jnp.max(jnp.abs(out_bf - ref))) < 0.5

    # ---- config B: ragged batch, padded lanes, tiled sequence axis (NP > 1) ----
    B2, N2, C2 = 3, 256, 48
    kk1, kk2, kk3 = jax.random.split(jax.random.PRNGKey(1), 3)
    cw2 = 0.02 * jax.random.truncated_normal(kk1, -2.0, 2.0, (C2, 2), jnp.float32)
    cwh2 = 0.02 * jax.random.truncated_normal(kk2, -2.0, 2.0, (C2, 2), jnp.float32)
    x2 = jax.random.normal(kk3, (B2, N2, C2), jnp.float32)
    out2 = adaptive_spectral_block(x2, cw2, cwh2, threshold_param,
                                   matmul_dtype=jnp.float32, seq_tile=128)
    out2 = jax.block_until_ready(out2)
    ref2 = _reference(x2, cw2, cwh2, threshold_param)
    assert bool(jnp.allclose(out2, ref2, atol=2e-3, rtol=2e-3)), \
        "Pallas kernel (tiled sequence axis) does not match JAX reference"

    print("KERNEL_OK")
</pallas_src>

<mosaic_0001>
module attributes {stable_mosaic.version = 11 : i64} {
  func.func @_adaptive_spectral_kernel(%arg0: i32, %arg1: i32, %arg2: memref<16x128xf32, #tpu.memory_space<vmem>>, %arg3: memref<32x16xf32, #tpu.memory_space<vmem>>, %arg4: memref<16x16xf32, #tpu.memory_space<vmem>>, %arg5: memref<16x16xf32, #tpu.memory_space<vmem>>, %arg6: memref<2x128xf32, #tpu.memory_space<vmem>>, %arg7: memref<4x128xf32, #tpu.memory_space<vmem>>, %arg8: memref<1x1xf32, #tpu.memory_space<smem>>, %arg9: memref<16x128xf32, #tpu.memory_space<vmem>>, %arg10: memref<32x128xf32, #tpu.memory_space<vmem>>, %arg11: memref<16x128xf32, #tpu.memory_space<vmem>>, %arg12: memref<16x128xf32, #tpu.memory_space<vmem>>) attributes {dimension_semantics = [#tpu.dimension_semantics<parallel>, #tpu.dimension_semantics<arbitrary>], iteration_bounds = array<i64: 1, 1>, scalar_prefetch = 0 : i64, scratch_operands = 3 : i64, tpu.core_type = #tpu.core_type<tc>, window_params = [{transform_indices = @transform_0, window_bounds = array<i64: 16, 128>}, {transform_indices = @transform_1, window_bounds = array<i64: 32, 16>}, {transform_indices = @transform_2, window_bounds = array<i64: 16, 16>}, {transform_indices = @transform_3, window_bounds = array<i64: 16, 16>}, {pipeline_mode = #tpu.pipeline_mode<synchronous>, transform_indices = @transform_4, window_bounds = array<i64: 2, 128>}, {pipeline_mode = #tpu.pipeline_mode<synchronous>, transform_indices = @transform_5, window_bounds = array<i64: 4, 128>}, {transform_indices = @transform_6, window_bounds = array<i64: 1, 1>}, {transform_indices = @transform_7, window_bounds = array<i64: 16, 128>}]} {
    %c0_i32 = arith.constant 0 : i32
    %0 = arith.cmpi eq, %arg1, %c0_i32 : i32
    %1 = arith.extui %0 : i1 to i32
    %c0_i32_0 = arith.constant 0 : i32
    %2 = arith.cmpi ne, %1, %c0_i32_0 : i32
    scf.if %2 {
      %cst = arith.constant 0.000000e+00 : f32
      %12 = vector.broadcast %cst : f32 to vector<32x128xf32>
      %c0 = arith.constant 0 : index
      %c0_6 = arith.constant 0 : index
      %13 = vector.load %arg10[%c0, %c0_6] : memref<32x128xf32, #tpu.memory_space<vmem>>, vector<32x128xf32>
      tpu.vector_store %arg10[%c0, %c0_6], %12 {strides = array<i32>} : memref<32x128xf32, #tpu.memory_space<vmem>>, vector<32x128xf32>,
    } else {
    }
    %c1_i32 = arith.constant 1 : i32
    %3 = arith.cmpi slt, %arg1, %c1_i32 : i32
    %4 = arith.extui %3 : i1 to i32
    %c0_i32_1 = arith.constant 0 : i32
    %5 = arith.cmpi ne, %4, %c0_i32_1 : i32
    scf.if %5 {
      %c0 = arith.constant 0 : index
      %c0_6 = arith.constant 0 : index
      %12 = vector.load %arg2[%c0, %c0_6] : memref<16x128xf32, #tpu.memory_space<vmem>>, vector<16x128xf32>
      %c0_7 = arith.constant 0 : index
      %c0_8 = arith.constant 0 : index
      %13 = vector.load %arg10[%c0_7, %c0_8] : memref<32x128xf32, #tpu.memory_space<vmem>>, vector<32x128xf32>
      %c0_9 = arith.constant 0 : index
      %c0_10 = arith.constant 0 : index
      %14 = vector.load %arg3[%c0_9, %c0_10] : memref<32x16xf32, #tpu.memory_space<vmem>>, vector<32x16xf32>
      %cst = arith.constant dense<0.000000e+00> : vector<32x128xf32>
      %15 = tpu.matmul %14, %12, %cst {dimension_numbers = #tpu.dot_dimension_numbers<[1], [0], [0], [1], [0, 0, 1, 1], [], []>} : vector<32x16xf32>, vector<16x128xf32>, vector<32x128xf32> -> vector<32x128xf32>
      %16 = arith.addf %13, %15 : vector<32x128xf32>
      %c0_11 = arith.constant 0 : index
      %c0_12 = arith.constant 0 : index
      %17 = vector.load %arg10[%c0_11, %c0_12] : memref<32x128xf32, #tpu.memory_space<vmem>>, vector<32x128xf32>
      tpu.vector_store %arg10[%c0_11, %c0_12], %16 {strides = array<i32>} : memref<32x128xf32, #tpu.memory_space<vmem>>, vector<32x128xf32>,
    } else {
    }
    %c0_i32_2 = arith.constant 0 : i32
    %6 = arith.cmpi eq, %arg1, %c0_i32_2 : i32
    %7 = arith.extui %6 : i1 to i32
    %c0_i32_3 = arith.constant 0 : i32
    %8 = arith.cmpi ne, %7, %c0_i32_3 : i32
    scf.if %8 {
      %c0 = arith.constant 0 : index
      %c0_6 = arith.constant 0 : index
      %12 = vector.load %arg10[%c0, %c0_6] : memref<32x128xf32, #tpu.memory_space<vmem>>, vector<16x128xf32>
      %c16 = arith.constant 16 : index
      %c0_7 = arith.constant 0 : index
      %13 = vector.load %arg10[%c16, %c0_7] : memref<32x128xf32, #tpu.memory_space<vmem>>, vector<16x128xf32>
      %c0_8 = arith.constant 0 : index
      %c0_9 = arith.constant 0 : index
      %14 = vector.load %arg6[%c0_8, %c0_9] : memref<2x128xf32, #tpu.memory_space<vmem>>, vector<2x128xf32>
      %15 = arith.mulf %12, %12 : vector<16x128xf32>
      %16 = arith.mulf %13, %13 : vector<16x128xf32>
      %17 = arith.addf %15, %16 : vector<16x128xf32>
      %cst = arith.constant dense<0.000000e+00> : vector<16x2xf32>
      %18 = tpu.matmul %17, %14, %cst {dimension_numbers = #tpu.dot_dimension_numbers<[1], [1], [0], [0], [0, 0, 1, 0], [], []>} : vector<16x128xf32>, vector<2x128xf32>, vector<16x2xf32> -> vector<16x2xf32>
      %19 = tpu.iota {dimensions = array<i32: 0>} : vector<16x16xi32>
      %20 = tpu.iota {dimensions = array<i32: 1>} : vector<16x16xi32>
      %21 = arith.cmpi ne, %19, %20 : vector<16x16xi32>
      %c9_i32 = arith.constant 9 : i32
      %22 = vector.broadcast %c9_i32 : i32 to vector<16x16xi32>
      %23 = arith.cmpi slt, %19, %22 : vector<16x16xi32>
      %24 = arith.andi %21, %23 : vector<16x16xi1>
      %25 = tpu.iota {dimensions = array<i32: 1>} : vector<1x16xi32>
      %c9_i32_10 = arith.constant 9 : i32
      %26 = vector.broadcast %c9_i32_10 : i32 to vector<1x16xi32>
      %27 = arith.cmpi slt, %25, %26 : vector<1x16xi32>
      %c0_11 = arith.constant 0 : index
      %c0_12 = arith.constant 0 : index
      %28 = memref.load %arg8[%c0_11, %c0_12] : memref<1x1xf32, #tpu.memory_space<smem>>
      %cst_13 = arith.constant 0.000000e+00 : f32
      %29 = vector.broadcast %cst_13 : f32 to vector<16x2xf32>
      %cst_14 = arith.constant 4.000000e+00 : f32
      %c0_i32_15 = arith.constant 0 : i32
      %30 = tpu.iota {dimensions = array<i32: 1>} : vector<1x2xi32>
      %31 = vector.broadcast %c0_i32_15 : i32 to vector<1x2xi32>
      %32 = arith.cmpi eq, %30, %31 : vector<1x2xi32>
      %33 = arith.extui %32 : vector<1x2xi1> to vector<1x2xi32>
      %34 = arith.sitofp %33 : vector<1x2xi32> to vector<1x2xf32>
      %35 = vector.broadcast %34 : vector<1x2xf32> to vector<16x2xf32>
      %36 = arith.mulf %18, %35 : vector<16x2xf32>
      %cst_16 = arith.constant dense<0.000000e+00> : vector<16xf32>
      %37 = vector.multi_reduction <add>, %36, %cst_16 [1] : vector<16x2xf32> to vector<16xf32>
      %38 = vector.shape_cast %37 : vector<16xf32> to vector<16x1xf32>
      %cst_17 = arith.constant dense<0.000000e+00> : vector<1x16xf32>
      %39 = tpu.matmul %34, %18, %cst_17 {dimension_numbers = #tpu.dot_dimension_numbers<[1], [1], [0], [0], [0, 0, 1, 0], [], []>} : vector<1x2xf32>, vector<16x2xf32>, vector<1x16xf32> -> vector<1x16xf32>
      %40 = vector.broadcast %38 : vector<16x1xf32> to vector<16x16xf32>
      %41 = vector.broadcast %39 : vector<1x16xf32> to vector<16x16xf32>
      %42 = arith.cmpf olt, %40, %41 : vector<16x16xf32>
      %43 = arith.andi %42, %24 : vector<16x16xi1>
      %44 = arith.extui %43 : vector<16x16xi1> to vector<16x16xi32>
      %45 = arith.sitofp %44 : vector<16x16xi32> to vector<16x16xf32>
      %46 = vector.broadcast %38 : vector<16x1xf32> to vector<16x16xf32>
      %47 = vector.broadcast %39 : vector<1x16xf32> to vector<16x16xf32>
      %48 = arith.cmpf oeq, %46, %47 : vector<16x16xf32>
      %49 = arith.andi %48, %24 : vector<16x16xi1>
      %50 = arith.extui %49 : vector<16x16xi1> to vector<16x16xi32>
      %51 = arith.sitofp %50 : vector<16x16xi32> to vector<16x16xf32>
      %cst_18 = arith.constant dense<0.000000e+00> : vector<16xf32>
      %52 = vector.multi_reduction <add>, %45, %cst_18 [0] : vector<16x16xf32> to vector<16xf32>
      %53 = vector.shape_cast %52 : vector<16xf32> to vector<1x16xf32>
      %cst_19 = arith.constant dense<0.000000e+00> : vector<16xf32>
      %54 = vector.multi_reduction <add>, %51, %cst_19 [0] : vector<16x16xf32> to vector<16xf32>
      %55 = vector.shape_cast %54 : vector<16xf32> to vector<1x16xf32>
      %56 = arith.addf %53, %55 : vector<1x16xf32>
      %cst_20 = arith.constant 1.000000e+00 : f32
      %57 = vector.broadcast %cst_20 : f32 to vector<1x16xf32>
      %58 = arith.addf %56, %57 : vector<1x16xf32>
      %59 = vector.broadcast %cst_14 : f32 to vector<1x16xf32>
      %60 = arith.cmpf ole, %53, %59 : vector<1x16xf32>
      %61 = vector.broadcast %cst_14 : f32 to vector<1x16xf32>
      %62 = arith.cmpf ogt, %58, %61 : vector<1x16xf32>
      %63 = arith.andi %60, %62 : vector<1x16xi1>
      %64 = arith.andi %63, %27 : vector<1x16xi1>
      %65 = arith.extui %64 : vector<1x16xi1> to vector<1x16xi32>
      %66 = arith.sitofp %65 : vector<1x16xi32> to vector<1x16xf32>
      %67 = arith.mulf %39, %66 : vector<1x16xf32>
      %cst_21 = arith.constant dense<0.000000e+00> : vector<1xf32>
      %68 = vector.multi_reduction <add>, %67, %cst_21 [1] : vector<1x16xf32> to vector<1xf32>
      %69 = vector.shape_cast %68 : vector<1xf32> to vector<1x1xf32>
      %cst_22 = arith.constant dense<0.000000e+00> : vector<1xf32>
      %70 = vector.multi_reduction <add>, %66, %cst_22 [1] : vector<1x16xf32> to vector<1xf32>
      %71 = vector.shape_cast %70 : vector<1xf32> to vector<1x1xf32>
      %cst_23 = arith.constant 1.000000e+00 : f32
      %72 = vector.broadcast %cst_23 : f32 to vector<1x1xf32>
      %73 = arith.maximumf %71, %72 : vector<1x1xf32>
      %74 = arith.divf %69, %73 : vector<1x1xf32>
      %cst_24 = arith.constant 9.99999997E-7 : f32
      %75 = vector.broadcast %cst_24 : f32 to vector<1x1xf32>
      %76 = arith.addf %74, %75 : vector<1x1xf32>
      %77 = vector.broadcast %76 : vector<1x1xf32> to vector<16x1xf32>
      %78 = arith.divf %38, %77 : vector<16x1xf32>
      %79 = vector.broadcast %28 : f32 to vector<16x1xf32>
      %80 = arith.cmpf ogt, %78, %79 : vector<16x1xf32>
      %81 = arith.extui %80 : vector<16x1xi1> to vector<16x1xi32>
      %82 = arith.sitofp %81 : vector<16x1xi32> to vector<16x1xf32>
      %83 = vector.broadcast %82 : vector<16x1xf32> to vector<16x2xf32>
      %84 = vector.broadcast %34 : vector<1x2xf32> to vector<16x2xf32>
      %85 = arith.mulf %83, %84 : vector<16x2xf32>
      %86 = arith.addf %29, %85 : vector<16x2xf32>
      %c1_i32_25 = arith.constant 1 : i32
      %87 = tpu.iota {dimensions = array<i32: 1>} : vector<1x2xi32>
      %88 = vector.broadcast %c1_i32_25 : i32 to vector<1x2xi32>
      %89 = arith.cmpi eq, %87, %88 : vector<1x2xi32>
      %90 = arith.extui %89 : vector<1x2xi1> to vector<1x2xi32>
      %91 = arith.sitofp %90 : vector<1x2xi32> to vector<1x2xf32>
      %92 = vector.broadcast %91 : vector<1x2xf32> to vector<16x2xf32>
      %93 = arith.mulf %18, %92 : vector<16x2xf32>
      %cst_26 = arith.constant dense<0.000000e+00> : vector<16xf32>
      %94 = vector.multi_reduction <add>, %93, %cst_26 [1] : vector<16x2xf32> to vector<16xf32>
      %95 = vector.shape_cast %94 : vector<16xf32> to vector<16x1xf32>
      %cst_27 = arith.constant dense<0.000000e+00> : vector<1x16xf32>
      %96 = tpu.matmul %91, %18, %cst_27 {dimension_numbers = #tpu.dot_dimension_numbers<[1], [1], [0], [0], [0, 0, 1, 0], [], []>} : vector<1x2xf32>, vector<16x2xf32>, vector<1x16xf32> -> vector<1x16xf32>
      %97 = vector.broadcast %95 : vector<16x1xf32> to vector<16x16xf32>
      %98 = vector.broadcast %96 : vector<1x16xf32> to vector<16x16xf32>
      %99 = arith.cmpf olt, %97, %98 : vector<16x16xf32>
      %100 = arith.andi %99, %24 : vector<16x16xi1>
      %101 = arith.extui %100 : vector<16x16xi1> to vector<16x16xi32>
      %102 = arith.sitofp %101 : vector<16x16xi32> to vector<16x16xf32>
      %103 = vector.broadcast %95 : vector<16x1xf32> to vector<16x16xf32>
      %104 = vector.broadcast %96 : vector<1x16xf32> to vector<16x16xf32>
      %105 = arith.cmpf oeq, %103, %104 : vector<16x16xf32>
      %106 = arith.andi %105, %24 : vector<16x16xi1>
      %107 = arith.extui %106 : vector<16x16xi1> to vector<16x16xi32>
      %108 = arith.sitofp %107 : vector<16x16xi32> to vector<16x16xf32>
      %cst_28 = arith.constant dense<0.000000e+00> : vector<16xf32>
      %109 = vector.multi_reduction <add>, %102, %cst_28 [0] : vector<16x16xf32> to vector<16xf32>
      %110 = vector.shape_cast %109 : vector<16xf32> to vector<1x16xf32>
      %cst_29 = arith.constant dense<0.000000e+00> : vector<16xf32>
      %111 = vector.multi_reduction <add>, %108, %cst_29 [0] : vector<16x16xf32> to vector<16xf32>
      %112 = vector.shape_cast %111 : vector<16xf32> to vector<1x16xf32>
      %113 = arith.addf %110, %112 : vector<1x16xf32>
      %cst_30 = arith.constant 1.000000e+00 : f32
      %114 = vector.broadcast %cst_30 : f32 to vector<1x16xf32>
      %115 = arith.addf %113, %114 : vector<1x16xf32>
      %116 = vector.broadcast %cst_14 : f32 to vector<1x16xf32>
      %117 = arith.cmpf ole, %110, %116 : vector<1x16xf32>
      %118 = vector.broadcast %cst_14 : f32 to vector<1x16xf32>
      %119 = arith.cmpf ogt, %115, %118 : vector<1x16xf32>
      %120 = arith.andi %117, %119 : vector<1x16xi1>
      %121 = arith.andi %120, %27 : vector<1x16xi1>
      %122 = arith.extui %121 : vector<1x16xi1> to vector<1x16xi32>
      %123 = arith.sitofp %122 : vector<1x16xi32> to vector<1x16xf32>
      %124 = arith.mulf %96, %123 : vector<1x16xf32>
      %cst_31 = arith.constant dense<0.000000e+00> : vector<1xf32>
      %125 = vector.multi_reduction <add>, %124, %cst_31 [1] : vector<1x16xf32> to vector<1xf32>
      %126 = vector.shape_cast %125 : vector<1xf32> to vector<1x1xf32>
      %cst_32 = arith.constant dense<0.000000e+00> : vector<1xf32>
      %127 = vector.multi_reduction <add>, %123, %cst_32 [1] : vector<1x16xf32> to vector<1xf32>
      %128 = vector.shape_cast %127 : vector<1xf32> to vector<1x1xf32>
      %cst_33 = arith.constant 1.000000e+00 : f32
      %129 = vector.broadcast %cst_33 : f32 to vector<1x1xf32>
      %130 = arith.maximumf %128, %129 : vector<1x1xf32>
      %131 = arith.divf %126, %130 : vector<1x1xf32>
      %cst_34 = arith.constant 9.99999997E-7 : f32
      %132 = vector.broadcast %cst_34 : f32 to vector<1x1xf32>
      %133 = arith.addf %131, %132 : vector<1x1xf32>
      %134 = vector.broadcast %133 : vector<1x1xf32> to vector<16x1xf32>
      %135 = arith.divf %95, %134 : vector<16x1xf32>
      %136 = vector.broadcast %28 : f32 to vector<16x1xf32>
      %137 = arith.cmpf ogt, %135, %136 : vector<16x1xf32>
      %138 = arith.extui %137 : vector<16x1xi1> to vector<16x1xi32>
      %139 = arith.sitofp %138 : vector<16x1xi32> to vector<16x1xf32>
      %140 = vector.broadcast %139 : vector<16x1xf32> to vector<16x2xf32>
      %141 = vector.broadcast %91 : vector<1x2xf32> to vector<16x2xf32>
      %142 = arith.mulf %140, %141 : vector<16x2xf32>
      %143 = arith.addf %86, %142 : vector<16x2xf32>
      %c2_i32 = arith.constant 2 : i32
      %cst_35 = arith.constant dense<0.000000e+00> : vector<16x128xf32>
      %144 = tpu.matmul %143, %14, %cst_35 {dimension_numbers = #tpu.dot_dimension_numbers<[1], [0], [0], [1], [0, 0, 1, 1], [], []>} : vector<16x2xf32>, vector<2x128xf32>, vector<16x128xf32> -> vector<16x128xf32>
      %c0_36 = arith.constant 0 : index
      %c0_37 = arith.constant 0 : index
      %145 = vector.load %arg7[%c0_36, %c0_37] : memref<4x128xf32, #tpu.memory_space<vmem>>, vector<1x128xf32>
      %c1 = arith.constant 1 : index
      %c0_38 = arith.constant 0 : index
      %146 = vector.load %arg7[%c1, %c0_38] : memref<4x128xf32, #tpu.memory_space<vmem>>, vector<1x128xf32>
      %c2 = arith.constant 2 : index
      %c0_39 = arith.constant 0 : index
      %147 = vector.load %arg7[%c2, %c0_39] : memref<4x128xf32, #tpu.memory_space<vmem>>, vector<1x128xf32>
      %c3 = arith.constant 3 : index
      %c0_40 = arith.constant 0 : index
      %148 = vector.load %arg7[%c3, %c0_40] : memref<4x128xf32, #tpu.memory_space<vmem>>, vector<1x128xf32>
      %149 = vector.broadcast %147 : vector<1x128xf32> to vector<16x128xf32>
      %150 = arith.mulf %144, %149 : vector<16x128xf32>
      %151 = vector.broadcast %145 : vector<1x128xf32> to vector<16x128xf32>
      %152 = arith.addf %151, %150 : vector<16x128xf32>
      %153 = vector.broadcast %148 : vector<1x128xf32> to vector<16x128xf32>
      %154 = arith.mulf %144, %153 : vector<16x128xf32>
      %155 = vector.broadcast %146 : vector<1x128xf32> to vector<16x128xf32>
      %156 = arith.addf %155, %154 : vector<16x128xf32>
      %157 = arith.mulf %12, %152 : vector<16x128xf32>
      %158 = arith.mulf %13, %156 : vector<16x128xf32>
      %159 = arith.subf %157, %158 : vector<16x128xf32>
      %c0_41 = arith.constant 0 : index
      %c0_42 = arith.constant 0 : index
      %160 = vector.load %arg11[%c0_41, %c0_42] : memref<16x128xf32, #tpu.memory_space<vmem>>, vector<16x128xf32>
      tpu.vector_store %arg11[%c0_41, %c0_42], %159 {strides = array<i32>} : memref<16x128xf32, #tpu.memory_space<vmem>>, vector<16x128xf32>,
      %161 = arith.mulf %12, %156 : vector<16x128xf32>
      %162 = arith.mulf %13, %152 : vector<16x128xf32>
      %163 = arith.addf %161, %162 : vector<16x128xf32>
      %c0_43 = arith.constant 0 : index
      %c0_44 = arith.constant 0 : index
      %164 = vector.load %arg12[%c0_43, %c0_44] : memref<16x128xf32, #tpu.memory_space<vmem>>, vector<16x128xf32>
      tpu.vector_store %arg12[%c0_43, %c0_44], %163 {strides = array<i32>} : memref<16x128xf32, #tpu.memory_space<vmem>>, vector<16x128xf32>,
    } else {
    }
    %c0_i32_4 = arith.constant 0 : i32
    %9 = arith.cmpi sge, %arg1, %c0_i32_4 : i32
    %10 = arith.extui %9 : i1 to i32
    %c0_i32_5 = arith.constant 0 : i32
    %11 = arith.cmpi ne, %10, %c0_i32_5 : i32
    scf.if %11 {
      %c0 = arith.constant 0 : index
      %c0_6 = arith.constant 0 : index
      %12 = vector.load %arg11[%c0, %c0_6] : memref<16x128xf32, #tpu.memory_space<vmem>>, vector<16x128xf32>
      %c0_7 = arith.constant 0 : index
      %c0_8 = arith.constant 0 : index
      %13 = vector.load %arg12[%c0_7, %c0_8] : memref<16x128xf32, #tpu.memory_space<vmem>>, vector<16x128xf32>
      %c0_9 = arith.constant 0 : index
      %c0_10 = arith.constant 0 : index
      %14 = vector.load %arg4[%c0_9, %c0_10] : memref<16x16xf32, #tpu.memory_space<vmem>>, vector<16x16xf32>
      %cst = arith.constant dense<0.000000e+00> : vector<16x128xf32>
      %15 = tpu.matmul %14, %12, %cst {dimension_numbers = #tpu.dot_dimension_numbers<[1], [0], [0], [1], [0, 0, 1, 1], [], []>} : vector<16x16xf32>, vector<16x128xf32>, vector<16x128xf32> -> vector<16x128xf32>
      %c0_11 = arith.constant 0 : index
      %c0_12 = arith.constant 0 : index
      %16 = vector.load %arg5[%c0_11, %c0_12] : memref<16x16xf32, #tpu.memory_space<vmem>>, vector<16x16xf32>
      %cst_13 = arith.constant dense<0.000000e+00> : vector<16x128xf32>
      %17 = tpu.matmul %16, %13, %cst_13 {dimension_numbers = #tpu.dot_dimension_numbers<[1], [0], [0], [1], [0, 0, 1, 1], [], []>} : vector<16x16xf32>, vector<16x128xf32>, vector<16x128xf32> -> vector<16x128xf32>
      %18 = arith.addf %15, %17 : vector<16x128xf32>
      %c0_14 = arith.constant 0 : index
      %c0_15 = arith.constant 0 : index
      %19 = vector.load %arg9[%c0_14, %c0_15] : memref<16x128xf32, #tpu.memory_space<vmem>>, vector<16x128xf32>
      tpu.vector_store %arg9[%c0_14, %c0_15], %18 {strides = array<i32>} : memref<16x128xf32, #tpu.memory_space<vmem>>, vector<16x128xf32>,
    } else {
    }
    return
  }
  func.func @transform_0(%arg0: i32, %arg1: i32) -> (i32, i32) {
    %c0_i32 = arith.constant 0 : i32
    %0 = arith.minsi %arg1, %c0_i32 : i32
    %c0_i32_0 = arith.constant 0 : i32
    return %0, %arg0 : i32, i32
  }
  func.func @transform_1(%arg0: i32, %arg1: i32) -> (i32, i32) {
    %c0_i32 = arith.constant 0 : i32
    %0 = arith.minsi %arg1, %c0_i32 : i32
    %c0_i32_0 = arith.constant 0 : i32
    %c0_i32_1 = arith.constant 0 : i32
    return %c0_i32_0, %0 : i32, i32
  }
  func.func @transform_2(%arg0: i32, %arg1: i32) -> (i32, i32) {
    %c0_i32 = arith.constant 0 : i32
    %0 = arith.subi %arg1, %c0_i32 : i32
    %c0_i32_0 = arith.constant 0 : i32
    %1 = arith.maxsi %0, %c0_i32_0 : i32
    %c0_i32_1 = arith.constant 0 : i32
    %c0_i32_2 = arith.constant 0 : i32
    return %1, %c0_i32_1 : i32, i32
  }
  func.func @transform_3(%arg0: i32, %arg1: i32) -> (i32, i32) {
    %c0_i32 = arith.constant 0 : i32
    %0 = arith.subi %arg1, %c0_i32 : i32
    %c0_i32_0 = arith.constant 0 : i32
    %1 = arith.maxsi %0, %c0_i32_0 : i32
    %c0_i32_1 = arith.constant 0 : i32
    %c0_i32_2 = arith.constant 0 : i32
    return %1, %c0_i32_1 : i32, i32
  }
  func.func @transform_4(%arg0: i32, %arg1: i32) -> (i32, i32) {
    %c0_i32 = arith.constant 0 : i32
    %c0_i32_0 = arith.constant 0 : i32
    %c0_i32_1 = arith.constant 0 : i32
    return %c0_i32, %c0_i32_0 : i32, i32
  }
  func.func @transform_5(%arg0: i32, %arg1: i32) -> (i32, i32) {
    %c0_i32 = arith.constant 0 : i32
    %c0_i32_0 = arith.constant 0 : i32
    %c0_i32_1 = arith.constant 0 : i32
    return %c0_i32, %c0_i32_0 : i32, i32
  }
  func.func @transform_6(%arg0: i32, %arg1: i32) -> (i32, i32) {
    %c0_i32 = arith.constant 0 : i32
    %c0_i32_0 = arith.constant 0 : i32
    %c0_i32_1 = arith.constant 0 : i32
    return %c0_i32, %c0_i32_0 : i32, i32
  }
  func.func @transform_7(%arg0: i32, %arg1: i32) -> (i32, i32) {
    %c0_i32 = arith.constant 0 : i32
    %0 = arith.subi %arg1, %c0_i32 : i32
    %c0_i32_0 = arith.constant 0 : i32
    %1 = arith.maxsi %0, %c0_i32_0 : i32
    %c0_i32_1 = arith.constant 0 : i32
    return %1, %arg0 : i32, i32
  }
}

</mosaic_0001>

<bundles_post_ra>
// kernel: tpu_custom_call.1
= control target key start
LH: loop header
LB: loop body
LE: loop exit
PB: predicated region body
PF: predicated region fallthrough
CT: control target
= control target key end

     0   :  { %vm50_vm0 = vcmask 130048   ;;  %s1305_s0 = inlined_call_operand.vmem [shape: f32[16,128], index: 0, kind: input, shape index: {}]   ;;  %s1306_s1 = inlined_call_operand.vmem [shape: f32[32,16], index: 1, kind: input, shape index: {}]   ;;  %s1307_s2 = inlined_call_operand.vmem [shape: f32[16,16], index: 2, kind: input, shape index: {}]   ;;  %s1308_s3 = inlined_call_operand.vmem [shape: f32[16,16], index: 3, kind: input, shape index: {}]   ;;  %s1309_s4 = inlined_call_operand.vmem [shape: f32[2,128], index: 4, kind: input, shape index: {}]   ;;  %s1310_s5 = inlined_call_operand.vmem [shape: f32[4,128], index: 5, kind: input, shape index: {}]   ;;  %s1311_s6 = inlined_call_operand.<no memory space> [shape: f32[1,1], index: 6, kind: input, shape index: {}]   ;;  %s1312_s7 = inlined_call_operand.hbm [shape: f32[16,128], index: 7, kind: output, shape index: {}]  }
   0x1   :  { %v41_v0 = vld [vmem:[%s1305_s0 + $0x8] sm:$0xff]  ;;  %v40_v1 = vld [vmem:[%s1305_s0] sm:$0xff] }
   0x2   :  { %v46_v2 = vld [vmem:[%s1306_s1] sm:$0xff]  ;;  %969 = vmatprep.subr.mxu0 %v41_v0  ;;  %v47_v3 = vld [vmem:[%s1306_s1 + $0x8] sm:$0xff] }
   0x3   :  { %973 = vmatprep.mubr.msk.f32.mxu0 %vm50_vm0, %v46_v2  ;;  %970 = vmatpush3.msra.mxu0 %v41_v0 }
   0x4   :  { %13 = vsyncpa [#allocation7], 0  ;;  %971 = vmatprep.subr.mxu0 %v40_v1  ;;  %v48_v4 = vld [vmem:[%s1306_s1 + $0x10] sm:$0xff]  ;;  %v49_v5 = vld [vmem:[%s1306_s1 + $0x18] sm:$0xff]  ;;  %v1052_v17 = vmov 0.0   ;;  %vm1053_vm1 = vmmov 0   ;;  %v245_v18 = vlaneseq }
   0x5   :  { %972 = vmatpush3.msra.mxu0 %v40_v1  ;;  %v1122_v6 = vld [vmem:[%s1309_s4] sm:$0x3]  ;;  %vm263_vm2 = vcmask 15360   ;;  %s1054_s28 = smov [#allocation6]  }
   0x6   :  { %974 = vmatmul.mubr.msk.f32.vlgmr.msra.gmra.mxu0 %vm50_vm0, %v47_v3  ;;  %979 = vmatprep.subr.mxu1 %v1122_v6  ;;  %v1146_v19 = vand.u32 127, %v245_v18  ;;  %v246_v32 = vshrl.u32 %v245_v18, 7  ;;  %s895_s29 = sshll.u32 %s1054_s28, 4  ;;  %s896_s29 = int_to_ptr.vmem [resolvable:$true] %s895_s29 }
   0x7   :  { %976 = vmatprep.mubr.msk.f32.mxu0 %vm50_vm0, %v48_v4  ;;  %980 = vmatpush3.xpose.msra.mxu1 %v1122_v6  ;;  %p1035_p1 = scmp.lt.s32.totalorder %s896_s29, %s896_s29 }
   0x8   :  { %984 = vmatprep.subr.mxu0 %v1052_v17  ;;  %991 = vmatprep.subr.mxu1 %v1052_v17  ;;  %vm426_vm3 = vcmp.eq.s32.totalorder %v1146_v19, 1  ;;  %vm258_vm4 = vcmp.eq.s32.totalorder %v1146_v19, 0  ;;  %v247_v34 = vadd.s32 8, %v246_v32  ;;  %v1176_v35 = vsub.s32 0, %v246_v32 }
   0x9   :  { %v1155_v22 = vsel %vm426_vm3, 1.0, %v1052_v17  ;;  %v1158_v23 = vsel %vm258_vm4, 1.0, %v1052_v17  ;;  %vm250_vm7 = vcmp.ne.s32.totalorder %v246_v32, %v1146_v19 }
   0xa   :  { %977 = vmatmul.mubr.msk.f32.gmra.mxu0 %vm50_vm0, %v49_v5  ;;  %vm251_vm5 = vcmp.ne.s32.totalorder %v247_v34, %v1146_v19  ;;  %vm253_vm6 = vcmp.lt.s32.totalorder %v247_v34, 9 }
   0xb   :  { %988 = vmatprep.mubr.msk.f32.mxu0 %vm1053_vm1, %v1052_v17  ;;  %vm1192_vm8 = vmand %vm251_vm5, %vm253_vm6 }
  0xc6   :  { %v1126_v7 = vpop.f32.mrf.mxu0 }
  0xc7   :  { %v165_v14 = vmul.f32 %v1126_v7, %v1126_v7 }
  0xc8   :  { %v1128_v8 = vpop.f32.mrf.mxu0 }
  0xc9   :  { %v164_v12 = vmul.f32 %v1128_v8, %v1128_v8 }
  0xca   :  { %v1130_v9 = vpop.f32.mrf.mxu0 }
  0xcb   :  { %v167_v10 = vmul.f32 %v1130_v9, %v1130_v9 }
  0xcc   :  { %v1134_v11 = vpop.f32.mrf.mxu0 }
  0xcd   :  { %v166_v13 = vmul.f32 %v1134_v11, %v1134_v11  ;;  %v169_v16 = vadd.f32 %v167_v10, %v165_v14 }
  0xcf   :  { %v168_v15 = vadd.f32 %v166_v13, %v164_v12 }
  0xd1   :  { %981 = vmatprep.mubr.f32.mxu1 %v168_v15 }
  0xd2   :  { %982 = vmatmul.mubr.f32.vlgmr.msra.gmra.mxu1 %v169_v16 }
  0xd3   :  { %995 = vmatprep.mubr.msk.f32.mxu1 %vm1053_vm1, %v1052_v17 }
 0x192   :  { %v983_v20 = vpop.f32.mrf.mxu1 }
 0x193   :  { %985 = vmatpush3.xpose.msk.msra.mxu0 %vm263_vm2, %v983_v20  ;;  %992 = vmatpush3.xpose.msk.msra.mxu1 %vm263_vm2, %v983_v20  ;;  %v430_v28 = vmul.f32 %v983_v20, %v1155_v22  ;;  %v262_v29 = vmul.f32 %v983_v20, %v1158_v23 }
 0x194   :  { %v236_v21 = vpop.f32.mrf.mxu1  ;;  %986 = vmatprep.subr.mxu0 %v1052_v17  ;;  %993 = vmatprep.subr.mxu1 %v1052_v17 }
 0x195   :  { %v429_v24 = vmul.f32 %v1155_v22, %v236_v21  ;;  %v261_v25 = vmul.f32 %v1158_v23, %v236_v21  ;;  %v434_v30 = vsel %vm263_vm2, %v430_v28, 0.0  ;;  %v267_v31 = vsel %vm263_vm2, %v262_v29, 0.0 }
 0x197   :  { %987 = vmatpush3.xpose.msk.msra.mxu0 %vm263_vm2, %v236_v21  ;;  %994 = vmatpush3.xpose.msk.msra.mxu1 %vm263_vm2, %v236_v21  ;;  %v431_v26 = vsel %vm263_vm2, %v429_v24, 0.0  ;;  %v264_v27 = vsel %vm263_vm2, %v261_v25, 0.0 }
 0x198   :  { %432 = vadd.xlane.f32.xlu1 %v431_v26  ;;  %265 = vadd.xlane.f32.xlu0 %v264_v27 }
 0x19a   :  { %989 = vmatmul.mubr.msk.f32.vlgmr.msra.gmra.mxu0 %vm263_vm2, %v1158_v23  ;;  %996 = vmatmul.mubr.msk.f32.vlgmr.msra.gmra.mxu1 %vm263_vm2, %v1155_v22 }
 0x19c   :  { %435 = vadd.xlane.f32.xlu1 %v434_v30  ;;  %268 = vadd.xlane.f32.xlu0 %v267_v31 }
 0x221   :  { %v1174_v33 = vpop.xlane.xlu0 %265  ;;  %v1178_v36 = vpop.xlane.xlu1 %432 }
 0x225   :  { %v1185_v39 = vpop.xlane.xlu0 %268  ;;  %v1202_v45 = vpop.xlane.xlu1 %435 }
 0x25a   :  { %v1181_v37 = vpop.f32.mrf.mxu0  ;;  %v1183_v38 = vpop.f32.mrf.mxu1 }
 0x25b   :  { %v352_v40 = vrot.slane %v1181_v37, %v1176_v35  ;;  %v513_v41 = vrot.slane %v1183_v38, %v1176_v35 }
 0x25c   :  { %v990_v43 = vpop.f32.mrf.mxu0  ;;  %v997_v44 = vpop.f32.mrf.mxu1 }
 0x25d   :  { %vm353_vm9 = vcmp.lt.f32.partialorder %v1174_v33, %v352_v40  ;;  %vm354_vm10 = vcmp.lt.f32.partialorder %v1185_v39, %v352_v40  ;;  %vm361_vm11 = vcmp.eq.f32.partialorder %v1174_v33, %v352_v40  ;;  %vm362_vm13 = vcmp.eq.f32.partialorder %v1185_v39, %v352_v40 }
 0x25e   :  { %vm355_vm12 = vmand %vm353_vm9, %vm250_vm7  ;;  %vm514_vm15 = vcmp.lt.f32.partialorder %v1178_v36, %v513_v41  ;;  %vm515_vm3 = vcmp.lt.f32.partialorder %v1202_v45, %v513_v41  ;;  %vm522_vm5 = vcmp.eq.f32.partialorder %v1178_v36, %v513_v41  ;;  %vm523_vm9 = vcmp.eq.f32.partialorder %v1202_v45, %v513_v41 }
 0x25f   :  { %vm356_vm14 = vmand %vm354_vm10, %vm1192_vm8  ;;  %v914_v46 = vsel %vm355_vm12, 1.0, %v1052_v17 }
 0x260   :  { %v915_v47 = vsel %vm356_vm14, 1.0, %v1052_v17  ;;  %vm363_vm1 = vmand %vm361_vm11, %vm250_vm7  ;;  %v370_v48 = vsel %vm50_vm0, %v914_v46, 0.0 }
 0x261   :  { %vm364_vm4 = vmand %vm362_vm13, %vm1192_vm8  ;;  %v916_v49 = vsel %vm363_vm1, 1.0, %v1052_v17  ;;  %v371_v50 = vsel %vm50_vm0, %v915_v47, 0.0 }
 0x262   :  { %v917_v51 = vsel %vm364_vm4, 1.0, %v1052_v17  ;;  %v379_v52 = vsel %vm50_vm0, %v916_v49, 0.0  ;;  %vm516_vm6 = vmand %vm514_vm15, %vm250_vm7  ;;  %v372_v53 = vadd.f32 %v371_v50, %v370_v48 }
 0x263   :  { %v380_v54 = vsel %vm50_vm0, %v917_v51, 0.0  ;;  %vm517_vm10 = vmand %vm515_vm3, %vm1192_vm8  ;;  %v925_v55 = vsel %vm516_vm6, 1.0, %v1052_v17  ;;  %vm397_vm6 = vcmask 122880  }
 0x264   :  { %v926_v56 = vsel %vm517_vm10, 1.0, %v1052_v17  ;;  %vm524_vm11 = vmand %vm522_vm5, %vm250_vm7  ;;  %v530_v57 = vsel %vm50_vm0, %v925_v55, 0.0  ;;  %v373_v58 = vrot.slane %v372_v53, 4  ;;  %v381_v59 = vadd.f32 %v380_v54, %v379_v52 }
 0x265   :  { %vm525_vm12 = vmand %vm523_vm9, %vm1192_vm8  ;;  %v927_v60 = vsel %vm524_vm11, 1.0, %v1052_v17  ;;  %v531_v61 = vsel %vm50_vm0, %v926_v56, 0.0  ;;  %vm256_vm7 = vcmp.lt.s32.totalorder %v1146_v19, 9  ;;  %vm590_vm9 = vcmask 1041408  }
 0x266   :  { %v928_v62 = vsel %vm525_vm12, 1.0, %v1052_v17  ;;  %v539_v63 = vsel %vm50_vm0, %v927_v60, 0.0  ;;  %v532_v0 = vadd.f32 %v531_v61, %v530_v57  ;;  %v374_v1 = vadd.f32 %v373_v58, %v372_v53  ;;  %998 = vmatprep.subr.msk.mxu0 %vm590_vm9, %v1122_v6 }
 0x267   :  { %v540_v2 = vsel %vm50_vm0, %v928_v62, 0.0  ;;  %v382_v3 = vrot.slane %v381_v59, 4  ;;  %999 = vmatpush3.msk.msra.mxu0 %vm590_vm9, %v1122_v6 }
 0x268   :  { %v533_v4 = vrot.slane %v532_v0, 4  ;;  %v541_v5 = vadd.f32 %v540_v2, %v539_v63  ;;  %v375_v10 = vrot.slane %v374_v1, 2 }
 0x269   :  { %v383_v12 = vadd.f32 %v382_v3, %v381_v59 }
 0x26a   :  { %v534_v13 = vadd.f32 %v533_v4, %v532_v0  ;;  %v542_v14 = vrot.slane %v541_v5, 4  ;;  %v376_v15 = vadd.f32 %v375_v10, %v374_v1  ;;  %v415_v1 = vstv %s1311_s6 }
 0x26b   :  { %v384_v16 = vrot.slane %v383_v12, 2 }
 0x26c   :  { %v535_v18 = vrot.slane %v534_v13, 2  ;;  %v543_v20 = vadd.f32 %v542_v14, %v541_v5  ;;  %v377_v21 = vrot.slane %v376_v15, 1 }
 0x26d   :  { %v385_v24 = vadd.f32 %v384_v16, %v383_v12 }
 0x26e   :  { %v536_v25 = vadd.f32 %v535_v18, %v534_v13  ;;  %v544_v26 = vrot.slane %v543_v20, 2  ;;  %v378_v27 = vadd.f32 %v377_v21, %v376_v15  ;;  %v936_v21 = vld [vmem:[%s1310_s5] ss:$0 sm:$0xff] }
 0x26f   :  { %v386_v28 = vrot.slane %v385_v24, 1 }
 0x270   :  { %v537_v29 = vrot.slane %v536_v25, 1  ;;  %v545_v30 = vadd.f32 %v544_v26, %v543_v20  ;;  %vm390_vm8 = vcmp.le.f32.partialorder %v378_v27, 4.0 }
 0x271   :  { %v387_v31 = vadd.f32 %v386_v28, %v385_v24  ;;  %v938_v24 = vld [vmem:[%s1310_s5 + $0x1] ss:$0 sm:$0xff] }
 0x272   :  { %v538_v32 = vadd.f32 %v537_v29, %v536_v25  ;;  %v546_v34 = vrot.slane %v545_v30, 1 }
 0x273   :  { %v388_v40 = vadd.f32 %v387_v31, %v378_v27 }
 0x274   :  { %v547_v41 = vadd.f32 %v546_v34, %v545_v30  ;;  %vm550_vm1 = vcmp.le.f32.partialorder %v538_v32, 4.0 }
 0x275   :  { %v389_v42 = vadd.f32 1.0, %v388_v40 }
 0x276   :  { %v548_v43 = vadd.f32 %v547_v41, %v538_v32 }
 0x277   :  { %vm391_vm13 = vcmp.gt.f32.partialorder %v389_v42, 4.0 }
 0x278   :  { %v549_v44 = vadd.f32 1.0, %v548_v43  ;;  %vm392_vm14 = vmand %vm390_vm8, %vm391_vm13 }
 0x279   :  { %vm393_vm15 = vmand %vm392_vm14, %vm256_vm7 }
 0x27a   :  { %vm551_vm3 = vcmp.gt.f32.partialorder %v549_v44, 4.0  ;;  %v918_v46 = vsel %vm393_vm15, 1.0, %v1052_v17 }
 0x27b   :  { %vm552_vm4 = vmand %vm550_vm1, %vm551_vm3  ;;  %v401_v47 = vsel %vm50_vm0, %v918_v46, 0.0  ;;  %v396_v48 = vmul.f32 %v918_v46, %v1181_v37 }
 0x27c   :  { %vm553_vm5 = vmand %vm552_vm4, %vm256_vm7  ;;  %402 = vadd.xlane.f32.xlu0 %v401_v47 }
 0x27d   :  { %v929_v19 = vsel %vm553_vm5, 1.0, %v1052_v17  ;;  %v398_v51 = vsel %vm397_vm6, %v396_v48, 0.0 }
 0x27e   :  { %v560_v49 = vsel %vm50_vm0, %v929_v19, 0.0  ;;  %v556_v50 = vmul.f32 %v929_v19, %v1183_v38 }
 0x27f   :  { %561 = vadd.xlane.f32.xlu1 %v560_v49 }
 0x280   :  { %399 = vadd.xlane.f32.xlu0 %v398_v51  ;;  %v557_v52 = vsel %vm397_vm6, %v556_v50, 0.0  ;;  %v722_v51 = vld [vmem:[%s1307_s2 + $0x8] sm:$0xff] }
 0x283   :  { %558 = vadd.xlane.f32.xlu1 %v557_v52 }
 0x305   :  { %v403_v37 = vpop.xlane.xlu0 %402 }
 0x306   :  { %v404_v53 = vmax.f32 %v403_v37, 1.0 }
 0x308   :  { %v562_v54 = vpop.xlane.xlu1 %561  ;;  %1022 = vrcp.f32 %v404_v53 }
 0x309   :  { %v563_v55 = vmax.f32 %v562_v54, 1.0  ;;  %v400_v57 = vpop.xlane.xlu0 %399 }
 0x30b   :  { %1024 = vrcp.f32 %v563_v55 }
 0x30c   :  { %v559_v59 = vpop.xlane.xlu1 %558 }
 0x315   :  { %v1023_v56 = vpop.eup %1022 }
 0x316   :  { %v406_v58 = vmul.f32 %v1023_v56, %v400_v57 }
 0x318   :  { %v1025_v38 = vpop.eup %1024  ;;  %v407_v60 = vadd.f32 1e-06, %v406_v58 }
 0x319   :  { %v565_v61 = vmul.f32 %v1025_v38, %v559_v59 }
 0x31a   :  { %v411_v62 = vrot.slane %v407_v60, %v1176_v35 }
 0x31b   :  { %v566_v63 = vadd.f32 1e-06, %v565_v61 }
 0x31c   :  { %1026 = vrcp.f32 %v411_v62 }
 0x31d   :  { %v570_v0 = vrot.slane %v566_v63, %v1176_v35 }
 0x31f   :  { %1028 = vrcp.f32 %v570_v0 }
 0x329   :  { %v1027_v6 = vpop.eup %1026 }
 0x32a   :  { %v414_v2 = vmul.f32 %v1027_v6, %v1185_v39  ;;  %v413_v3 = vmul.f32 %v1027_v6, %v1174_v33 }
 0x32c   :  { %v1029_v4 = vpop.eup %1028  ;;  %vm416_vm10 = vcmp.gt.f32.partialorder %v413_v3, %v415_v1  ;;  %vm417_vm11 = vcmp.gt.f32.partialorder %v414_v2, %v415_v1 }
 0x32d   :  { %v573_v5 = vmul.f32 %v1029_v4, %v1202_v45  ;;  %v919_v10 = vsel %vm416_vm10, 1.0, %v1052_v17  ;;  %v572_v12 = vmul.f32 %v1029_v4, %v1178_v36  ;;  %v920_v35 = vsel %vm417_vm11, 1.0, %v1052_v17  ;;  %v723_v36 = vld [vmem:[%s1308_s3] sm:$0xff] }
 0x32e   :  { %v422_v13 = vmul.f32 %v919_v10, %v1158_v23  ;;  %v423_v14 = vmul.f32 %v920_v35, %v1158_v23  ;;  %v721_v23 = vld [vmem:[%s1307_s2] sm:$0xff]  ;;  %1007 = vmatprep.mubr.msk.f32.mxu1 %vm50_vm0, %v723_v36  ;;  %s1030_s2 = scalar_lea.vmem %s896_s29, 256 }
 0x32f   :  { %vm574_vm12 = vcmp.gt.f32.partialorder %v572_v12, %v415_v1  ;;  %vm575_vm7 = vcmp.gt.f32.partialorder %v573_v5, %v415_v1  ;;  %p1031_p0 = scmp.ne.s32.totalorder %s896_s29, %s1030_s2  ;;  %p1036_p2 = scmp.lt.s32.totalorder %s1030_s2, %s1030_s2 }
 0x330   :  { %v930_v39 = vsel %vm574_vm12, 1.0, %v1052_v17  ;;  %v931_v33 = vsel %vm575_vm7, 1.0, %v1052_v17  ;;  %v935_v17 = vld [vmem:[%s1310_s5 + $0x2] ss:$0 sm:$0xff] }
 0x331   :  { %v580_v15 = vmul.f32 %v930_v39, %v1155_v22  ;;  %v581_v45 = vmul.f32 %v931_v33, %v1155_v22  ;;  %v937_v22 = vld [vmem:[%s1310_s5 + $0x3] ss:$0 sm:$0xff]  ;;  %p1037_p3 = por %p1036_p2, %p1035_p1 }
 0x333   :  { %v582_v16 = vadd.f32 %v580_v15, %v422_v13  ;;  %v583_v18 = vadd.f32 %v581_v45, %v423_v14  ;;  %p1038_p4 = pnand %p1037_p3, %p1031_p0 }
 0x335   :  { %1000 = vmatprep.mubr.msk.f32.mxu0 %vm263_vm2, %v582_v16 }
 0x336   :  { %1001 = vmatmul.mubr.msk.f32.vlgmr.msra.gmra.mxu0 %vm263_vm2, %v583_v18 }
 0x337   :  { %1014 = vmatprep.mubr.msk.f32.mxu0 %vm50_vm0, %v721_v23 }
 0x3f6   :  { %v1002_v20 = vpop.f32.mrf.mxu0 }
 0x3f7   :  { %v678_v25 = vmul.f32 %v1002_v20, %v935_v17  ;;  %v690_v26 = vmul.f32 %v1002_v20, %v937_v22 }
 0x3f8   :  { %v660_v27 = vpop.f32.mrf.mxu0 }
 0x3f9   :  { %v684_v28 = vadd.f32 %v936_v21, %v678_v25  ;;  %v696_v29 = vadd.f32 %v938_v24, %v690_v26  ;;  %v677_v30 = vmul.f32 %v935_v17, %v660_v27  ;;  %v689_v31 = vmul.f32 %v937_v22, %v660_v27 }
 0x3fb   :  { %v698_v32 = vmul.f32 %v1126_v7, %v684_v28  ;;  %v700_v34 = vmul.f32 %v1130_v9, %v696_v29  ;;  %v706_v40 = vmul.f32 %v1126_v7, %v696_v29  ;;  %v708_v41 = vmul.f32 %v1130_v9, %v684_v28  ;;  %v724_v9 = vld [vmem:[%s1308_s3 + $0x8] sm:$0xff] }
 0x3fc   :  { %v683_v42 = vadd.f32 %v936_v21, %v677_v30  ;;  %v695_v43 = vadd.f32 %v938_v24, %v689_v31 }
 0x3fd   :  { %v710_v44 = vadd.f32 %v708_v41, %v706_v40  ;;  %v702_v46 = vsub.f32 %v698_v32, %v700_v34 }
 0x3fe   :  { %v697_v47 = vmul.f32 %v683_v42, %v1128_v8  ;;  %v699_v48 = vmul.f32 %v695_v43, %v1134_v11  ;;  %v705_v19 = vmul.f32 %v695_v43, %v1128_v8  ;;  %v707_v49 = vmul.f32 %v683_v42, %v1134_v11 }
 0x3ff   :  { %1003 = vmatprep.subr.mxu1 %v710_v44  ;;  %1010 = vmatprep.subr.mxu0 %v702_v46 }
 0x400   :  { %1004 = vmatpush3.msra.mxu1 %v710_v44  ;;  %1011 = vmatpush3.msra.mxu0 %v702_v46  ;;  %v709_v50 = vadd.f32 %v707_v49, %v705_v19  ;;  %v701_v7 = vsub.f32 %v697_v47, %v699_v48 }
 0x402   :  { %1005 = vmatprep.subr.mxu1 %v709_v50  ;;  %1012 = vmatprep.subr.mxu0 %v701_v7 }
 0x403   :  { %1006 = vmatpush3.msra.mxu1 %v709_v50  ;;  %1013 = vmatpush3.msra.mxu0 %v701_v7 }
 0x404   :  { %1008 = vmatmul.mubr.msk.f32.vlgmr.msra.gmra.mxu1 %vm50_vm0, %v724_v9  ;;  %1015 = vmatmul.mubr.msk.f32.vlgmr.msra.gmra.mxu0 %vm50_vm0, %v722_v51 }
 0x4c4   :  { %v1009_v8 = vpop.f32.mrf.mxu1  ;;  %v1016_v11 = vpop.f32.mrf.mxu0 }
 0x4c5   :  { %v885_v52 = vadd.f32 %v1016_v11, %v1009_v8 }
 0x4c6   :  { %v798_v37 = vpop.f32.mrf.mxu1  ;;  %v879_v53 = vpop.f32.mrf.mxu0 }
 0x4c7   :  { %889 = vst [vmem:[#allocation6 + $0x8] sm:$0xff] %v885_v52  ;;  %v880_v54 = vadd.f32 %v879_v53, %v798_v37 }
 0x4c9   :  { %888 = vst [vmem:[#allocation6] sm:$0xff] %v880_v54 }
 0x4ca   :  { %1041 = shalt.err (!%p1038_p4)
}
 0x4cb   :  { %s1055_s3 = smov 128   ;;  %s1056_s30 = smov 8  }
 0x4cc   :  { %901 = dma.vmem_to_hbm [thread:$0]  %s896_s29, 256, %s1312_s7, [#allocation7], %s1055_s3, %s1055_s3, %s1056_s30  }
 0x4cd   :  { %1050 = dma.done.wait [#allocation7], 256  }
 0x4ce   :  { %1051 = vsyncadd [#allocation7], 4294967040 }
 0x4cf   :  { %905 = vsyncpa [#allocation7], 1 }

</bundles_post_ra>
